<compile_context>
chip_gen: v7x
topology: tpu7x:2x2x1
jax: 0.10.0
libtpu: 0.0.40
codegen_flags: <defaults>
</compile_context>

<pallas_src>
import numpy as np
import jax
import jax.numpy as jnp
from jax.experimental import pallas as pl
from jax.experimental.pallas import tpu as pltpu

# ---------------------------------------------------------------------------
# Problem sizes (real channel counts of the torch module, small spatial dims)
# ---------------------------------------------------------------------------
B = 2
H_IN = W_IN = 64          # input image spatial size
STRIDE = 8                # both backbone features are stride-8
H = H_IN // STRIDE
W = W_IN // STRIDE
HW = H * W                # 64
BHW = B * HW              # 128

EFF_C = 40                # efficientnet_b0 features_only out_indices=(2,)
SWIN_C = 192              # swin_tiny_patch4_window7_224 out_indices=(1,)
FUSED_C = EFF_C + SWIN_C  # 232
FUSED_P = 256             # lane-dense padded fused channels
TGT_C = 168               # target_channels
TGT_P = 256               # lane-dense padded target channels
RED_C = TGT_C // 16       # CBAM reduction=16 -> 10
RED_P = 128               # lane-dense padded reduction channels
SA_K = 7                  # CBAM spatial-attention conv kernel size


# ---------------------------------------------------------------------------
# Pallas kernel: one batch per grid step (grid=(B,), parallel).
# ---------------------------------------------------------------------------
def gif_head_kernel(fused_ref,    # (HW, FUSED_P)  bf16, this batch's features
                    wred_ref,     # (FUSED_P, TGT_P) bf16, BN scale folded in
                    bnb_ref,      # (1, TGT_P)     f32 folded BN bias (0 in pad)
                    caw1_ref,     # (TGT_P, RED_P) bf16
                    caw2_ref,     # (RED_P, TGT_P) bf16
                    sam_ref,      # (HW, 2*HW)     f32  [sam_avg | sam_max]
                    out_ref):     # (HW, TGT_P)    f32
    # 1x1 reduce conv (BN scale pre-folded into wred) + BN bias + ReLU
    y = jnp.dot(fused_ref[...], wred_ref[...],
                preferred_element_type=jnp.float32)           # (HW, TGT_P) f32
    y = jnp.maximum(y + bnb_ref[...], 0.0)                    # pads stay 0

    # --- ResCBAM: channel attention (shared MLP, one fused matmul pair) ----
    avg_c = jnp.mean(y, axis=0, keepdims=True)                # (1, TGT_P)
    max_c = jnp.max(y, axis=0, keepdims=True)                 # (1, TGT_P)
    pooled = jnp.concatenate([avg_c, max_c], axis=0).astype(jnp.bfloat16)
    hid = jnp.maximum(
        jnp.dot(pooled, caw1_ref[...], preferred_element_type=jnp.float32),
        0.0)                                                  # (2, RED_P)
    mlp = jnp.dot(hid.astype(jnp.bfloat16), caw2_ref[...],
                  preferred_element_type=jnp.float32)         # (2, TGT_P)
    ca = jax.nn.sigmoid(mlp[0:1, :] + mlp[1:2, :])            # (1, TGT_P)

    # --- ResCBAM: spatial attention (shared 7x7-conv matrix, one dot) ------
    # mean over the REAL 168 channels (padded lanes are exactly zero);
    # max is unaffected by the zero padding because y_ca >= 0.
    y_ca = y * ca                                             # transient
    avg_s = jnp.sum(y_ca, axis=1, keepdims=True) * (1.0 / TGT_C)  # (HW, 1)
    max_s = jnp.max(y_ca, axis=1, keepdims=True)                  # (HW, 1)
    s_cat = jnp.concatenate([avg_s, max_s], axis=0)               # (2*HW, 1)
    sa = jax.nn.sigmoid(
        jnp.dot(sam_ref[...], s_cat, preferred_element_type=jnp.float32))

    # residual (ResCBAM) + Dropout2d eval-mode identity, factored so the full
    # y_ca temporary is not needed for the final add:  y + y*ca*sa
    out_ref[...] = (y * (1.0 + ca * sa)).astype(out_ref.dtype)


def gif_head_pallas(fused2d, kp):
    """fused2d: (B*HW, FUSED_P) bf16  ->  (B*HW, TGT_P) f32 (NHWC-flat)."""
    return pl.pallas_call(
        gif_head_kernel,
        out_shape=jax.ShapeDtypeStruct((BHW, TGT_P), jnp.float32),
        grid_spec=pltpu.PrefetchScalarGridSpec(
            num_scalar_prefetch=0,
            grid=(B,),                               # one batch per step
            in_specs=[
                pl.BlockSpec((HW, FUSED_P), lambda b: (b, 0)),
                pl.BlockSpec((FUSED_P, TGT_P), lambda b: (0, 0)),
                pl.BlockSpec((1, TGT_P), lambda b: (0, 0)),
                pl.BlockSpec((TGT_P, RED_P), lambda b: (0, 0)),
                pl.BlockSpec((RED_P, TGT_P), lambda b: (0, 0)),
                pl.BlockSpec((HW, 2 * HW), lambda b: (0, 0)),
            ],
            out_specs=pl.BlockSpec((HW, TGT_P), lambda b: (b, 0)),
        ),
        compiler_params=pltpu.CompilerParams(
            dimension_semantics=("parallel",)),
    )(fused2d, kp["w_red"], kp["bn_bias"], kp["ca_w1"], kp["ca_w2"], kp["sam"])


# ---------------------------------------------------------------------------
# Plain-JAX reference of the same head (test-only; NOT in the forward path)
# ---------------------------------------------------------------------------
def gif_head_ref(eff_flat, swin_flat, p):
    fused = jnp.concatenate([eff_flat, swin_flat], axis=-1)     # (B,HW,232)
    y = jnp.einsum("bpc,co->bpo", fused, p["w_reduce"])
    y = y * p["bn_scale"] + p["bn_bias"]
    y = jnp.maximum(y, 0.0)
    avg_c = y.mean(axis=1, keepdims=True)
    max_c = y.max(axis=1, keepdims=True)

    def mlp(v):
        h = jnp.maximum(jnp.einsum("bpc,cr->bpr", v, p["ca_w1"]), 0.0)
        return jnp.einsum("bpr,rc->bpc", h, p["ca_w2"])

    ca = jax.nn.sigmoid(mlp(avg_c) + mlp(max_c))
    y_ca = y * ca
    avg_s = y_ca.mean(axis=2, keepdims=True)
    max_s = y_ca.max(axis=2, keepdims=True)
    sa = jax.nn.sigmoid(
        jnp.einsum("pq,bqo->bpo", p["sam_avg"], avg_s) +
        jnp.einsum("pq,bqo->bpo", p["sam_max"], max_s))
    return y + y_ca * sa


# ---------------------------------------------------------------------------
# Parameter construction (deterministic)
# ---------------------------------------------------------------------------
def build_sa_conv_matrix(w_c):
    """w_c: (7,7) numpy. Returns (HW, HW) M with out = M @ in_flat for a
    same-padded 7x7 conv over an (H, W) map flattened row-major."""
    pad = SA_K // 2
    m = np.zeros((HW, HW), np.float32)
    for i in range(H):
        for j in range(W):
            for dy in range(SA_K):
                for dx in range(SA_K):
                    ii, jj = i + dy - pad, j + dx - pad
                    if 0 <= ii < H and 0 <= jj < W:
                        m[i * W + j, ii * W + jj] += w_c[dy, dx]
    return m


def make_params(key):
    ks = jax.random.split(key, 10)
    w_reduce = (jax.random.normal(ks[0], (FUSED_C, TGT_C), jnp.float32)
                / np.sqrt(FUSED_C))
    gamma = jax.random.uniform(ks[1], (TGT_C,), jnp.float32, 0.5, 1.5)
    beta = 0.1 * jax.random.normal(ks[2], (TGT_C,), jnp.float32)
    run_mean = 0.1 * jax.random.normal(ks[3], (TGT_C,), jnp.float32)
    run_var = jax.random.uniform(ks[4], (TGT_C,), jnp.float32, 0.5, 1.5)
    bn_scale = gamma / jnp.sqrt(run_var + 1e-5)
    bn_bias = beta - run_mean * bn_scale

    ca_w1 = (jax.random.normal(ks[5], (TGT_C, RED_C), jnp.float32)
             / np.sqrt(TGT_C))
    ca_w2 = (jax.random.normal(ks[6], (RED_C, TGT_C), jnp.float32)
             / np.sqrt(RED_C))

    sa_w = 0.1 * jax.random.normal(ks[7], (2, SA_K, SA_K), jnp.float32)
    sa_w_np = np.asarray(sa_w)
    sam_avg = jnp.asarray(build_sa_conv_matrix(sa_w_np[0]))
    sam_max = jnp.asarray(build_sa_conv_matrix(sa_w_np[1]))

    # stand-in backbone channel projections (see TODO at top)
    w_eff = 0.2 * jax.random.normal(ks[8], (3, EFF_C), jnp.float32)
    w_swin = 0.2 * jax.random.normal(ks[9], (3, SWIN_C), jnp.float32)

    return dict(
        w_reduce=w_reduce,
        bn_scale=bn_scale.reshape(1, TGT_C),
        bn_bias=bn_bias.reshape(1, TGT_C),
        ca_w1=ca_w1, ca_w2=ca_w2,
        sam_avg=sam_avg, sam_max=sam_max,
        w_eff=w_eff, w_swin=w_swin,
    )


def pack_params(p):
    """Fold BN scale into the reduce weight, pad to lane-dense shapes, bf16."""
    # BN scale folded per output channel into the 1x1 conv weight
    w_red = p["w_reduce"] * p["bn_scale"].reshape(1, TGT_C)        # (232, 168)
    w_red = jnp.pad(w_red, ((0, FUSED_P - FUSED_C), (0, TGT_P - TGT_C)))
    sam = jnp.concatenate([p["sam_avg"], p["sam_max"]], axis=1)    # (64, 128)
    return dict(
        w_red=w_red.astype(jnp.bfloat16),                          # (256, 256)
        bn_bias=jnp.pad(p["bn_bias"], ((0, 0), (0, TGT_P - TGT_C))),  # (1,256)
        ca_w1=jnp.pad(p["ca_w1"], ((0, TGT_P - TGT_C),
                                   (0, RED_P - RED_C))).astype(jnp.bfloat16),
        ca_w2=jnp.pad(p["ca_w2"], ((0, RED_P - RED_C),
                                   (0, TGT_P - TGT_C))).astype(jnp.bfloat16),
        sam=sam,                                                   # (64, 128) f32
    )


# ---------------------------------------------------------------------------
# Backbone stand-ins (plain JAX glue) + full forward (NCHW -> NCHW)
# ---------------------------------------------------------------------------
def backbone_standin(x, params):
    """Returns NHWC-flattened stand-in features (B, HW, EFF_C) / (B, HW, SWIN_C)."""
    xp = x.reshape(B, 3, H, STRIDE, W, STRIDE).mean(axis=(3, 5))   # (B,3,H,W)
    xp_flat = jnp.transpose(xp, (0, 2, 3, 1)).reshape(B, HW, 3)    # (B,HW,3)
    eff_flat = jnp.einsum("bpc,co->bpo", xp_flat, params["w_eff"])   # (B,HW,40)
    swin_flat = jnp.einsum("bpc,co->bpo", xp_flat, params["w_swin"]) # (B,HW,192)
    return eff_flat, swin_flat


def stage2_gif_forward(x, params, kparams):
    eff_flat, swin_flat = backbone_standin(x, params)
    # channel concat (== torch.cat on dim=1 in NCHW), pad to 256 lanes, bf16
    fused = jnp.concatenate([eff_flat, swin_flat], axis=-1).reshape(BHW, FUSED_C)
    fused = jnp.pad(fused, ((0, 0), (0, FUSED_P - FUSED_C))).astype(jnp.bfloat16)
    out_p = gif_head_pallas(fused, kparams)
    out_nhwc = out_p[:, :TGT_C].reshape(B, H, W, TGT_C)
    return jnp.transpose(out_nhwc, (0, 3, 1, 2))                   # NCHW


if __name__ == "__main__":
    key = jax.random.PRNGKey(0)
    k_x, k_p = jax.random.split(key)
    params = make_params(k_p)
    kparams = pack_params(params)
    x = jax.random.normal(k_x, (B, 3, H_IN, W_IN), jnp.float32)

    out = jax.jit(stage2_gif_forward)(x, params, kparams)
    jax.block_until_ready(out)
    assert out.shape == (B, TGT_C, H, W), out.shape

    # correctness check against the plain-JAX f32 reference (test-only path)
    eff_flat, swin_flat = backbone_standin(x, params)
    ref_flat = gif_head_ref(eff_flat, swin_flat, params)
    out_flat = jnp.transpose(out, (0, 2, 3, 1)).reshape(B, HW, TGT_C)
    err = float(jnp.max(jnp.abs(out_flat - ref_flat)))
    if not np.isfinite(err) or err > 3e-2:
        raise AssertionError(f"kernel mismatch vs reference, max err {err}")
    print("KERNEL_OK")
</pallas_src>

<mosaic_0001>
module attributes {stable_mosaic.version = 11 : i64} {
  func.func @gif_head_kernel(%arg0: i32, %arg1: memref<64x256xbf16, #tpu.memory_space<vmem>>, %arg2: memref<256x256xbf16, #tpu.memory_space<vmem>>, %arg3: memref<1x256xf32, #tpu.memory_space<vmem>>, %arg4: memref<256x128xbf16, #tpu.memory_space<vmem>>, %arg5: memref<128x256xbf16, #tpu.memory_space<vmem>>, %arg6: memref<64x128xf32, #tpu.memory_space<vmem>>, %arg7: memref<64x256xf32, #tpu.memory_space<vmem>>) attributes {dimension_semantics = [#tpu.dimension_semantics<parallel>], iteration_bounds = array<i64: 2>, scalar_prefetch = 0 : i64, scratch_operands = 0 : i64, tpu.core_type = #tpu.core_type<tc>, window_params = [{transform_indices = @transform_0, window_bounds = array<i64: 64, 256>}, {pipeline_mode = #tpu.pipeline_mode<synchronous>, transform_indices = @transform_1, window_bounds = array<i64: 256, 256>}, {pipeline_mode = #tpu.pipeline_mode<synchronous>, transform_indices = @transform_2, window_bounds = array<i64: 1, 256>}, {pipeline_mode = #tpu.pipeline_mode<synchronous>, transform_indices = @transform_3, window_bounds = array<i64: 256, 128>}, {pipeline_mode = #tpu.pipeline_mode<synchronous>, transform_indices = @transform_4, window_bounds = array<i64: 128, 256>}, {pipeline_mode = #tpu.pipeline_mode<synchronous>, transform_indices = @transform_5, window_bounds = array<i64: 64, 128>}, {transform_indices = @transform_6, window_bounds = array<i64: 64, 256>}]} {
    %c0 = arith.constant 0 : index
    %c0_0 = arith.constant 0 : index
    %0 = vector.load %arg1[%c0, %c0_0] : memref<64x256xbf16, #tpu.memory_space<vmem>>, vector<64x256xbf16>
    %c0_1 = arith.constant 0 : index
    %c0_2 = arith.constant 0 : index
    %1 = vector.load %arg2[%c0_1, %c0_2] : memref<256x256xbf16, #tpu.memory_space<vmem>>, vector<256x256xbf16>
    %cst = arith.constant dense<0.000000e+00> : vector<64x256xf32>
    %2 = tpu.matmul %0, %1, %cst {dimension_numbers = #tpu.dot_dimension_numbers<[1], [0], [0], [1], [0, 0, 1, 1], [], []>} : vector<64x256xbf16>, vector<256x256xbf16>, vector<64x256xf32> -> vector<64x256xf32>
    %c0_3 = arith.constant 0 : index
    %c0_4 = arith.constant 0 : index
    %3 = vector.load %arg3[%c0_3, %c0_4] : memref<1x256xf32, #tpu.memory_space<vmem>>, vector<1x256xf32>
    %4 = vector.broadcast %3 : vector<1x256xf32> to vector<64x256xf32>
    %5 = arith.addf %2, %4 : vector<64x256xf32>
    %cst_5 = arith.constant 0.000000e+00 : f32
    %6 = vector.broadcast %cst_5 : f32 to vector<64x256xf32>
    %7 = arith.maximumf %5, %6 : vector<64x256xf32>
    %cst_6 = arith.constant dense<0.000000e+00> : vector<256xf32>
    %8 = vector.multi_reduction <add>, %7, %cst_6 [0] : vector<64x256xf32> to vector<256xf32>
    %9 = vector.shape_cast %8 : vector<256xf32> to vector<1x256xf32>
    %cst_7 = arith.constant 6.400000e+01 : f32
    %10 = vector.broadcast %cst_7 : f32 to vector<1x256xf32>
    %11 = arith.divf %9, %10 : vector<1x256xf32>
    %cst_8 = arith.constant dense<0xFF800000> : vector<256xf32>
    %12 = vector.multi_reduction <maximumf>, %7, %cst_8 [0] : vector<64x256xf32> to vector<256xf32>
    %13 = vector.shape_cast %12 : vector<256xf32> to vector<1x256xf32>
    %14 = tpu.concatenate %11, %13 in 0 : vector<1x256xf32>, vector<1x256xf32> -> vector<2x256xf32>
    %15 = arith.truncf %14 : vector<2x256xf32> to vector<2x256xbf16>
    %c0_9 = arith.constant 0 : index
    %c0_10 = arith.constant 0 : index
    %16 = vector.load %arg4[%c0_9, %c0_10] : memref<256x128xbf16, #tpu.memory_space<vmem>>, vector<256x128xbf16>
    %cst_11 = arith.constant dense<0.000000e+00> : vector<2x128xf32>
    %17 = tpu.matmul %15, %16, %cst_11 {dimension_numbers = #tpu.dot_dimension_numbers<[1], [0], [0], [1], [0, 0, 1, 1], [], []>} : vector<2x256xbf16>, vector<256x128xbf16>, vector<2x128xf32> -> vector<2x128xf32>
    %cst_12 = arith.constant 0.000000e+00 : f32
    %18 = vector.broadcast %cst_12 : f32 to vector<2x128xf32>
    %19 = arith.maximumf %17, %18 : vector<2x128xf32>
    %20 = arith.truncf %19 : vector<2x128xf32> to vector<2x128xbf16>
    %c0_13 = arith.constant 0 : index
    %c0_14 = arith.constant 0 : index
    %21 = vector.load %arg5[%c0_13, %c0_14] : memref<128x256xbf16, #tpu.memory_space<vmem>>, vector<128x256xbf16>
    %cst_15 = arith.constant dense<0.000000e+00> : vector<2x256xf32>
    %22 = tpu.matmul %20, %21, %cst_15 {dimension_numbers = #tpu.dot_dimension_numbers<[1], [0], [0], [1], [0, 0, 1, 1], [], []>} : vector<2x128xbf16>, vector<128x256xbf16>, vector<2x256xf32> -> vector<2x256xf32>
    %23 = vector.extract_strided_slice %22 {offsets = [0, 0], sizes = [1, 256], strides = [1, 1]} : vector<2x256xf32> to vector<1x256xf32>
    %24 = vector.extract_strided_slice %22 {offsets = [1, 0], sizes = [1, 256], strides = [1, 1]} : vector<2x256xf32> to vector<1x256xf32>
    %25 = arith.addf %23, %24 : vector<1x256xf32>
    %26 = arith.negf %25 : vector<1x256xf32>
    %27 = math.exp %26 : vector<1x256xf32>
    %cst_16 = arith.constant 1.000000e+00 : f32
    %28 = vector.broadcast %cst_16 : f32 to vector<1x256xf32>
    %29 = arith.addf %28, %27 : vector<1x256xf32>
    %30 = arith.divf %28, %29 : vector<1x256xf32>
    %31 = vector.broadcast %30 : vector<1x256xf32> to vector<64x256xf32>
    %32 = arith.mulf %7, %31 : vector<64x256xf32>
    %cst_17 = arith.constant dense<0.000000e+00> : vector<64xf32>
    %33 = vector.multi_reduction <add>, %32, %cst_17 [1] : vector<64x256xf32> to vector<64xf32>
    %34 = vector.shape_cast %33 : vector<64xf32> to vector<64x1xf32>
    %cst_18 = arith.constant 0.00595238106 : f32
    %35 = vector.broadcast %cst_18 : f32 to vector<64x1xf32>
    %36 = arith.mulf %34, %35 : vector<64x1xf32>
    %cst_19 = arith.constant dense<0xFF800000> : vector<64xf32>
    %37 = vector.multi_reduction <maximumf>, %32, %cst_19 [1] : vector<64x256xf32> to vector<64xf32>
    %38 = vector.shape_cast %37 : vector<64xf32> to vector<64x1xf32>
    %39 = tpu.concatenate %36, %38 in 0 : vector<64x1xf32>, vector<64x1xf32> -> vector<128x1xf32>
    %c0_20 = arith.constant 0 : index
    %c0_21 = arith.constant 0 : index
    %40 = vector.load %arg6[%c0_20, %c0_21] : memref<64x128xf32, #tpu.memory_space<vmem>>, vector<64x128xf32>
    %cst_22 = arith.constant dense<0.000000e+00> : vector<64x1xf32>
    %41 = tpu.matmul %40, %39, %cst_22 {dimension_numbers = #tpu.dot_dimension_numbers<[1], [0], [0], [1], [0, 0, 1, 1], [], []>} : vector<64x128xf32>, vector<128x1xf32>, vector<64x1xf32> -> vector<64x1xf32>
    %42 = arith.negf %41 : vector<64x1xf32>
    %43 = math.exp %42 : vector<64x1xf32>
    %cst_23 = arith.constant 1.000000e+00 : f32
    %44 = vector.broadcast %cst_23 : f32 to vector<64x1xf32>
    %45 = arith.addf %44, %43 : vector<64x1xf32>
    %46 = arith.divf %44, %45 : vector<64x1xf32>
    %47 = vector.broadcast %30 : vector<1x256xf32> to vector<64x256xf32>
    %48 = vector.broadcast %46 : vector<64x1xf32> to vector<64x256xf32>
    %49 = arith.mulf %47, %48 : vector<64x256xf32>
    %cst_24 = arith.constant 1.000000e+00 : f32
    %50 = vector.broadcast %cst_24 : f32 to vector<64x256xf32>
    %51 = arith.addf %50, %49 : vector<64x256xf32>
    %52 = arith.mulf %7, %51 : vector<64x256xf32>
    %c0_25 = arith.constant 0 : index
    %c0_26 = arith.constant 0 : index
    %53 = vector.load %arg7[%c0_25, %c0_26] : memref<64x256xf32, #tpu.memory_space<vmem>>, vector<64x256xf32>
    tpu.vector_store %arg7[%c0_25, %c0_26], %52 {strides = array<i32>} : memref<64x256xf32, #tpu.memory_space<vmem>>, vector<64x256xf32>,
    return
  }
  func.func @transform_0(%arg0: i32) -> (i32, i32) {
    %c0_i32 = arith.constant 0 : i32
    %c0_i32_0 = arith.constant 0 : i32
    return %arg0, %c0_i32 : i32, i32
  }
  func.func @transform_1(%arg0: i32) -> (i32, i32) {
    %c0_i32 = arith.constant 0 : i32
    %c0_i32_0 = arith.constant 0 : i32
    %c0_i32_1 = arith.constant 0 : i32
    return %c0_i32, %c0_i32_0 : i32, i32
  }
  func.func @transform_2(%arg0: i32) -> (i32, i32) {
    %c0_i32 = arith.constant 0 : i32
    %c0_i32_0 = arith.constant 0 : i32
    %c0_i32_1 = arith.constant 0 : i32
    return %c0_i32, %c0_i32_0 : i32, i32
  }
  func.func @transform_3(%arg0: i32) -> (i32, i32) {
    %c0_i32 = arith.constant 0 : i32
    %c0_i32_0 = arith.constant 0 : i32
    %c0_i32_1 = arith.constant 0 : i32
    return %c0_i32, %c0_i32_0 : i32, i32
  }
  func.func @transform_4(%arg0: i32) -> (i32, i32) {
    %c0_i32 = arith.constant 0 : i32
    %c0_i32_0 = arith.constant 0 : i32
    %c0_i32_1 = arith.constant 0 : i32
    return %c0_i32, %c0_i32_0 : i32, i32
  }
  func.func @transform_5(%arg0: i32) -> (i32, i32) {
    %c0_i32 = arith.constant 0 : i32
    %c0_i32_0 = arith.constant 0 : i32
    %c0_i32_1 = arith.constant 0 : i32
    return %c0_i32, %c0_i32_0 : i32, i32
  }
  func.func @transform_6(%arg0: i32) -> (i32, i32) {
    %c0_i32 = arith.constant 0 : i32
    %c0_i32_0 = arith.constant 0 : i32
    return %arg0, %c0_i32 : i32, i32
  }
}

</mosaic_0001>

<bundles_post_ra>
// kernel: stage2_gif_forward.1
= control target key start
LH: loop header
LB: loop body
LE: loop exit
PB: predicated region body
PF: predicated region fallthrough
CT: control target
= control target key end

     0   :  { %11 = vsyncpa [#allocation3], 0  ;;  %s2422_s0 = inlined_call_operand.vmem [shape: bf16[128,256], index: 0, kind: input, shape index: {}]   ;;  %s2423_s1 = inlined_call_operand.vmem [shape: bf16[256,256], index: 1, kind: input, shape index: {}]   ;;  %s2424_s2 = inlined_call_operand.vmem [shape: f32[1,256], index: 2, kind: input, shape index: {}]   ;;  %s2425_s3 = inlined_call_operand.vmem [shape: bf16[256,128], index: 3, kind: input, shape index: {}]   ;;  %s2426_s4 = inlined_call_operand.vmem [shape: bf16[128,256], index: 4, kind: input, shape index: {}]   ;;  %s2427_s5 = inlined_call_operand.vmem [shape: f32[64,128], index: 5, kind: input, shape index: {}]   ;;  %s2428_s6 = inlined_call_operand.hbm [shape: f32[128,256], index: 6, kind: output, shape index: {}]  }
   0x1   :  { %13 = vsyncpa [#allocation3 + $0x1], 0  ;;  %s1931_s21 = smov 0   ;;  %s1933_s22 = smov 0  }
   0x2   :  { %s1935_s23 = smov 0   ;;  %s1937_s24 = smov 0  }
   0x3 LB: > { %s1952_s25 = sadd.s32 4294967295, %s1890_s24   ;;  %s1407_s26 = sadd.s32 4294967294, %s1890_s24   ;;  %s1890_s24 = sphi %s1937_s24, %s2434_s24   ;;  %s1886_s23 = sphi %s1935_s23, %s2433_s23   ;;  %s1882_s22 = sphi %s1933_s22, %s2432_s22   ;;  %s1878_s21 = sphi %s1931_s21, %s2431_s21  }
   0x4   : > { %s1956_s27 = sadd.s32 1, %s1890_s24   ;;  %s157_s28 = sadd.s32 1, %s1886_s23 }
   0x5   : > { %s154_s29 = ssub.s32 %s1890_s24, %s1956_s27  ;;  %p167_p0 = scmp.ne.s32.totalorder %s1886_s23, %s1882_s22 }
   0x6   : > { %p155_p1 = scmp.eq.s32.totalorder %s154_s29, 0  ;;  %p168_p2 = scmp.eq.s32.totalorder %s1952_s25, 1 }
   0x7   : > { %p173_p3 = scmp.ne.s32.totalorder %s1882_s22, %s1878_s21  ;;  %p174_p4 = scmp.eq.s32.totalorder %s1407_s26, 1 }
   0x8   : > { %s1967_s30 = scalar_select %p155_p1, %s1886_s23, %s157_s28  }
   0x9   : > { %p1969_p5 = por %p168_p2, %p167_p0  ;;  %p1973_p6 = por %p174_p4, %p173_p3 }
   0xa   : > { %p1410_p7 = scmp.ge.s32.totalorder %s1890_s24, 1  ;;  %p217_p8 = scmp.lt.s32.totalorder %s1890_s24, 3 }
   0xc   : > { %p218_p9 = pnand %p1410_p7, %p217_p8 }
   0xd   : > { %v1688_v0 = vld [vmem:[%s2423_s1 + $0x4] ss:$8 sps:$4 sm:$0xff] (!%p218_p9)   ;;  %v1690_v1 = vld [vmem:[%s2423_s1] ss:$8 sps:$4 sm:$0xff] (!%p218_p9)   ;;  %v1691_v2 = vld [vmem:[%s2423_s1 + $0x14] ss:$8 sps:$4 sm:$0xff] (!%p218_p9)   ;;  %v299_v57 = vlaneseq (!%p218_p9) }
   0xe   : > { %221 = sbr.rel (%p218_p9) target bundleno = 1402 (0x57a), region = 44  ;;  %509 = vmatprep.subr.bf16.mxu0 (!%p218_p9), %v1688_v0  ;;  %v1693_v3 = vld [vmem:[%s2423_s1 + $0x10] ss:$8 sps:$4 sm:$0xff] (!%p218_p9)   ;;  %v1694_v4 = vld [vmem:[%s2423_s1 + $0x24] ss:$8 sps:$4 sm:$0xff] (!%p218_p9)   ;;  %s1412_s19 = sshll.u32 (!%p218_p9), %s1952_s25, 3 }
   0xf   : > { %510 = vmatpush1.bf16.msra.mxu0 (!%p218_p9), %v1690_v1  ;;  %v1696_v5 = vld [vmem:[%s2423_s1 + $0x20] ss:$8 sps:$4 sm:$0xff] (!%p218_p9)   ;;  %v1697_v6 = vld [vmem:[%s2423_s1 + $0x34] ss:$8 sps:$4 sm:$0xff] (!%p218_p9)   ;;  %p249_p10 = scmp.lt.s32.totalorder (!%p218_p9), %s1412_s19, 15  ;;  %v300_v58 = vshrl.u32 (!%p218_p9), %v299_v57, 7 }
  0x10   : > { %511 = vmatprep.subr.bf16.mxu0 (!%p218_p9), %v1691_v2  ;;  %v1699_v7 = vld [vmem:[%s2423_s1 + $0x30] ss:$8 sps:$4 sm:$0xff] (!%p218_p9)   ;;  %v1700_v8 = vld [vmem:[%s2423_s1 + $0x44] ss:$8 sps:$4 sm:$0xff] (!%p218_p9)   ;;  %v1702_v9 = vld [vmem:[%s2423_s1 + $0x40] ss:$8 sps:$4 sm:$0xff] (!%p218_p9)  }
  0x11   : > { %v1703_v10 = vld [vmem:[%s2423_s1 + $0x54] ss:$8 sps:$4 sm:$0xff] (!%p218_p9)   ;;  %v1705_v11 = vld [vmem:[%s2423_s1 + $0x50] ss:$8 sps:$4 sm:$0xff] (!%p218_p9)   ;;  %v1706_v12 = vld [vmem:[%s2423_s1 + $0x64] ss:$8 sps:$4 sm:$0xff] (!%p218_p9)  }
  0x12   : > { %v1708_v14 = vld [vmem:[%s2423_s1 + $0x60] ss:$8 sps:$4 sm:$0xff] (!%p218_p9)   ;;  %v1709_v15 = vld [vmem:[%s2423_s1 + $0x74] ss:$8 sps:$4 sm:$0xff] (!%p218_p9)   ;;  %v1711_v16 = vld [vmem:[%s2423_s1 + $0x70] ss:$8 sps:$4 sm:$0xff] (!%p218_p9)  }
  0x13   : > { %512 = vmatpush1.bf16.msra.mxu0 (!%p218_p9), %v1693_v3  ;;  %v1712_v17 = vld [vmem:[%s2423_s1 + $0x84] ss:$8 sps:$4 sm:$0xff] (!%p218_p9)   ;;  %v1714_v18 = vld [vmem:[%s2423_s1 + $0x80] ss:$8 sps:$4 sm:$0xff] (!%p218_p9)   ;;  %v1715_v19 = vld [vmem:[%s2423_s1 + $0x94] ss:$8 sps:$4 sm:$0xff] (!%p218_p9)  }
  0x14   : > { %513 = vmatprep.subr.bf16.mxu0 (!%p218_p9), %v1694_v4  ;;  %v1717_v20 = vld [vmem:[%s2423_s1 + $0x90] ss:$8 sps:$4 sm:$0xff] (!%p218_p9)   ;;  %v1718_v21 = vld [vmem:[%s2423_s1 + $0xa4] ss:$8 sps:$4 sm:$0xff] (!%p218_p9)   ;;  %v1720_v22 = vld [vmem:[%s2423_s1 + $0xa0] ss:$8 sps:$4 sm:$0xff] (!%p218_p9)  }
  0x15   : > { %s2436_s19 = smov (!%p249_p10, %s1412_s19), 15  ;;  %v1721_v23 = vld [vmem:[%s2423_s1 + $0xb4] ss:$8 sps:$4 sm:$0xff]   ;;  %v1723_v24 = vld [vmem:[%s2423_s1 + $0xb0] ss:$8 sps:$4 sm:$0xff]   ;;  %v1748_v40 = vld [vmem:[%s2425_s3 + $0x40] sm:$0xff]  }
  0x16   : > { %s1503_s17 = sshll.u32 %s2436_s19, 3  ;;  %v1724_v25 = vld [vmem:[%s2423_s1 + $0xc4] ss:$8 sps:$4 sm:$0xff]   ;;  %v1726_v26 = vld [vmem:[%s2423_s1 + $0xc0] ss:$8 sps:$4 sm:$0xff]   ;;  %1506 = vmatprep.subr.bf16.mxu1 %v1748_v40  ;;  %v1752_v44 = vld [vmem:[%s2425_s3 + $0x50] sm:$0xff]  }
  0x17   : > { %514 = vmatpush1.bf16.msra.mxu0 %v1696_v5  ;;  %s2019_s29 = scalar_lea.vmem %s2422_s0, %s1503_s17  ;;  %v1727_v27 = vld [vmem:[%s2423_s1 + $0xd4] ss:$8 sps:$4 sm:$0xff]   ;;  %v1729_v28 = vld [vmem:[%s2423_s1 + $0xd0] ss:$8 sps:$4 sm:$0xff]   ;;  %v1730_v29 = vld [vmem:[%s2423_s1 + $0xe4] ss:$8 sps:$4 sm:$0xff]  }
  0x18   : > { %515 = vmatprep.subr.bf16.mxu0 %v1697_v6  ;;  %v1738_v13 = vld [vmem:[%s2019_s29 + $0x4] ss:$8 sps:$4 sm:$0xff]   ;;  %v1732_v30 = vld [vmem:[%s2423_s1 + $0xe0] ss:$8 sps:$4 sm:$0xff]   ;;  %v1733_v31 = vld [vmem:[%s2423_s1 + $0xf4] ss:$8 sps:$4 sm:$0xff]  }
  0x19   : > { %541 = vmatprep.mubr.bf16.mxu0 %v1738_v13  ;;  %v1735_v32 = vld [vmem:[%s2423_s1 + $0xf0] ss:$8 sps:$4 sm:$0xff]   ;;  %v1736_v33 = vld [vmem:[%s2019_s29] ss:$8 sps:$4 sm:$0xff]   ;;  %v1739_v34 = vld [vmem:[%s2019_s29 + $0x14] ss:$8 sps:$4 sm:$0xff]  }
  0x1a   : > { %v1741_v35 = vld [vmem:[%s2019_s29 + $0x10] ss:$8 sps:$4 sm:$0xff]   ;;  %v1742_v36 = vld [vmem:[%s2019_s29 + $0x24] ss:$8 sps:$4 sm:$0xff]   ;;  %v1744_v37 = vld [vmem:[%s2019_s29 + $0x20] ss:$8 sps:$4 sm:$0xff]  }
  0x1b   : > { %516 = vmatpush1.bf16.msra.mxu0 %v1699_v7  ;;  %v1745_v38 = vld [vmem:[%s2019_s29 + $0x34] ss:$8 sps:$4 sm:$0xff]   ;;  %v1747_v39 = vld [vmem:[%s2019_s29 + $0x30] ss:$8 sps:$4 sm:$0xff]   ;;  %v1749_v41 = vld [vmem:[%s2425_s3] sm:$0xff]   ;;  %v2140_v60 = vsub.s32 0, %v300_v58 }
  0x1c   : > { %517 = vmatprep.subr.bf16.mxu0 %v1700_v8  ;;  %1507 = vmatpush3.bf16.msra.mxu1 %v1749_v41  ;;  %v1750_v42 = vld [vmem:[%s2425_s3 + $0x48] sm:$0xff]   ;;  %v1753_v45 = vld [vmem:[%s2425_s3 + $0x10] sm:$0xff]   ;;  %v1754_v46 = vld [vmem:[%s2425_s3 + $0x58] sm:$0xff]   ;;  %v305_v63 = vsub.s32 1, %v300_v58  ;;  %vm653_vm0 = vcmask 1040384   ;;  %s245_s13 = sand.u32 1, %s1882_s22  }
  0x1d   : > { %v1751_v43 = vld [vmem:[%s2425_s3 + $0x8] sm:$0xff]   ;;  %1508 = vmatprep.subr.bf16.mxu1 %v1750_v42  ;;  %v1755_v47 = vld [vmem:[%s2425_s3 + $0x18] sm:$0xff]   ;;  %v1756_v48 = vld [vmem:[%s2425_s3 + $0x60] sm:$0xff]   ;;  %s1411_s29 = sshll.u32 %s245_s13, 7  ;;  %s1505_s15 = sshll.u32 %s1952_s25, 11 }
  0x1e   : > { %v1757_v49 = vld [vmem:[%s2425_s3 + $0x20] sm:$0xff]   ;;  %v1758_v50 = vld [vmem:[%s2425_s3 + $0x68] sm:$0xff]   ;;  %v1760_v52 = vld [vmem:[%s2425_s3 + $0x70] sm:$0xff]   ;;  %s2330_s14 = scalar_lea.vmem [#allocation2], %s1411_s29  ;;  %s2371_s20 = scalar_lea.hbm %s2428_s6, %s1505_s15 }
  0x1f   : > { %518 = vmatpush1.bf16.msra.mxu0 %v1702_v9  ;;  %v1759_v51 = vld [vmem:[%s2425_s3 + $0x28] sm:$0xff]   ;;  %v1761_v53 = vld [vmem:[%s2425_s3 + $0x30] sm:$0xff]   ;;  %v1762_v54 = vld [vmem:[%s2425_s3 + $0x78] sm:$0xff]   ;;  %s1345_s16 = sshll.u32 %s2330_s14, 4  ;;  %s2381_s25 = scalar_lea.sflag [#allocation3], %s245_s13  ;;  %s2373_s16 = int_to_ptr.vmem [resolvable:$true] %s1345_s16 }
  0x20   : > { %519 = vmatprep.subr.bf16.mxu0 %v1703_v10  ;;  %1509 = vmatpush3.bf16.msra.mxu1 %v1751_v43  ;;  %v1763_v55 = vld [vmem:[%s2425_s3 + $0x38] sm:$0xff]   ;;  %v1766_v56 = vld [vmem:[%s2426_s4 + $0x4] ss:$8 sps:$4 sm:$0xff]   ;;  %v297_v62 = vld [vmem:[%s2424_s2] sm:$0x3]  ;;  %s1828_s26 = scalar_lea.vmem %s2373_s16, 2048 }
  0x21   : > { %1510 = vmatprep.subr.bf16.mxu1 %v1752_v44  ;;  %v302_v2 = vrot.slane %v297_v62, %v2140_v60  ;;  %v306_v3 = vrot.slane %v297_v62, %v305_v63  ;;  %p1829_p11 = scmp.ne.s32.totalorder %s2373_s16, %s1828_s26  ;;  %s1893_s28 = smov [#allocation2]  }
  0x22   : > { %s1832_s9 = sshll.u32 %s1893_s28, 4  ;;  %s1833_s9 = int_to_ptr.vmem [resolvable:$false] %s1832_s9 }
  0x23   : > { %520 = vmatpush1.bf16.msra.mxu0 %v1705_v11  ;;  %p1830_p12 = pnand %p1829_p11, %p1969_p5  ;;  %s1834_s10 = scalar_lea.vmem %s1833_s9, 4096 }
  0x24   : > { %521 = vmatprep.subr.bf16.mxu0 %v1706_v12  ;;  %1511 = vmatpush3.bf16.msra.mxu1 %v1753_v45  ;;  %p1835_p0 = scmp.lt.s32.totalorder %s2373_s16, %s1833_s9  ;;  %p1836_p1 = scmp.lt.s32.totalorder %s1834_s10, %s1828_s26 }
  0x25   : > { %1512 = vmatprep.subr.bf16.mxu1 %v1754_v46  ;;  %p1831_p13 = pneg %p1830_p12 }
  0x26   : > { %p1837_p2 = por %p1836_p1, %p1835_p0 }
  0x27   : > { %522 = vmatpush1.bf16.msra.mxu0 %v1708_v14 }
  0x28   : > { %523 = vmatprep.subr.bf16.mxu0 %v1709_v15  ;;  %1513 = vmatpush3.bf16.msra.mxu1 %v1755_v47  ;;  %p1838_p3 = pnand %p1837_p2, %p1831_p13 }
  0x29   : > { %1514 = vmatprep.subr.bf16.mxu1 %v1756_v48 }
  0x2b   : > { %524 = vmatpush1.bf16.msra.mxu0 %v1711_v16 }
  0x2c   : > { %525 = vmatprep.subr.bf16.mxu0 %v1712_v17  ;;  %1515 = vmatpush3.bf16.msra.mxu1 %v1757_v49 }
  0x2d   : > { %1516 = vmatprep.subr.bf16.mxu1 %v1758_v50 }
  0x2f   : > { %526 = vmatpush1.bf16.msra.mxu0 %v1714_v18 }
  0x30   : > { %527 = vmatprep.subr.bf16.mxu0 %v1715_v19  ;;  %1517 = vmatpush3.bf16.msra.mxu1 %v1759_v51 }
  0x31   : > { %1518 = vmatprep.subr.bf16.mxu1 %v1760_v52 }
  0x33   : > { %528 = vmatpush1.bf16.msra.mxu0 %v1717_v20 }
  0x34   : > { %529 = vmatprep.subr.bf16.mxu0 %v1718_v21  ;;  %1519 = vmatpush3.bf16.msra.mxu1 %v1761_v53 }
  0x35   : > { %1520 = vmatprep.subr.bf16.mxu1 %v1762_v54 }
  0x37   : > { %530 = vmatpush1.bf16.msra.mxu0 %v1720_v22 }
  0x38   : > { %531 = vmatprep.subr.bf16.mxu0 %v1721_v23  ;;  %1521 = vmatpush3.bf16.msra.mxu1 %v1763_v55 }
  0x39   : > { %924 = vmatprep.subr.bf16.mxu1 %v1766_v56 }
  0x3b   : > { %532 = vmatpush1.bf16.msra.mxu0 %v1723_v24 }
  0x3c   : > { %533 = vmatprep.subr.bf16.mxu0 %v1724_v25 }
  0x3f   : > { %534 = vmatpush1.bf16.msra.mxu0 %v1726_v26 }
  0x40   : > { %535 = vmatprep.subr.bf16.mxu0 %v1727_v27 }
  0x43   : > { %536 = vmatpush1.bf16.msra.mxu0 %v1729_v28 }
  0x44   : > { %537 = vmatprep.subr.bf16.mxu0 %v1730_v29 }
  0x47   : > { %538 = vmatpush1.bf16.msra.mxu0 %v1732_v30 }
  0x48   : > { %539 = vmatprep.subr.bf16.mxu0 %v1733_v31 }
  0x4b   : > { %540 = vmatpush1.bf16.msra.mxu0 %v1735_v32 }
  0x4e   : > { %542 = vmatmul.mubr.bf16.vlgmr.msra.gmra.mrb[0].mxu0 %v1736_v33 }
  0x4f   : > { %551 = vmatprep.mubr.bf16.mxu0 %v1739_v34 }
  0x56   : > { %552 = vmatmul.mubr.bf16.gmra.mrb[4].mxu0 %v1741_v35 }
  0x57   : > { %561 = vmatprep.mubr.bf16.mxu0 %v1742_v36 }
  0x5e   : > { %562 = vmatmul.mubr.bf16.gmra.mrb[8].mxu0 %v1744_v37 }
  0x5f   : > { %571 = vmatprep.mubr.bf16.mxu0 %v1745_v38 }
  0x66   : > { %572 = vmatmul.mubr.bf16.gmra.mrb[12].mxu0 %v1747_v39 }
 0x121   : > { %v543_v59 = vpop.f32.mrb[0].mxu0 }
 0x122   : > { %v545_v61 = vpop.f32.mrb[1].mxu0  ;;  %v544_v7 = vadd.f32 %v543_v59, %v302_v2 }
 0x123   : > { %v547_v0 = vpop.f32.mrb[2].mxu0  ;;  %v546_v10 = vadd.f32 %v545_v61, %v306_v3 }
 0x124   : > { %v549_v1 = vpop.f32.mrb[3].mxu0  ;;  %v548_v4 = vadd.f32 %v547_v0, %v302_v2  ;;  %v2150_v16 = vmax.f32 %v544_v7, 0.0 }
 0x125   : > { %v550_v5 = vadd.f32 %v549_v1, %v306_v3  ;;  %v2154_v19 = vmax.f32 %v546_v10, 0.0 }
 0x126   : > { %v2146_v13 = vmax.f32 %v548_v4, 0.0 }
 0x127   : > { %v2148_v15 = vmax.f32 %v550_v5, 0.0 }
 0x128   : > { %v598_v22 = vadd.f32 %v2146_v13, %v2150_v16 }
 0x129   : > { %v553_v6 = vpop.f32.mrb[4].mxu0  ;;  %v611_v23 = vadd.f32 %v2148_v15, %v2154_v19 }
 0x12a   : > { %v554_v8 = vadd.f32 %v553_v6, %v302_v2  ;;  %v555_v9 = vpop.f32.mrb[5].mxu0 }
 0x12b   : > { %v556_v11 = vadd.f32 %v555_v9, %v306_v3  ;;  %v557_v12 = vpop.f32.mrb[6].mxu0 }
 0x12c   : > { %v559_v14 = vpop.f32.mrb[7].mxu0  ;;  %v2152_v17 = vmax.f32 %v554_v8, 0.0  ;;  %v558_v18 = vadd.f32 %v557_v12, %v302_v2 }
 0x12d   : > { %v2156_v20 = vmax.f32 %v556_v11, 0.0  ;;  %v560_v21 = vadd.f32 %v559_v14, %v306_v3 }
 0x12e   : > { %v599_v25 = vadd.f32 %v598_v22, %v2152_v17  ;;  %v2163_v26 = vmax.f32 %v558_v18, 0.0  ;;  %v627_v47 = vmax.f32 %v2150_v16, %v2152_v17 }
 0x12f   : > { %v612_v29 = vadd.f32 %v611_v23, %v2156_v20  ;;  %v2166_v30 = vmax.f32 %v560_v21, 0.0  ;;  %v640_v48 = vmax.f32 %v2154_v19, %v2156_v20 }
 0x130   : > { %v600_v38 = vadd.f32 %v599_v25, %v2163_v26  ;;  %v628_v51 = vmax.f32 %v2146_v13, %v2163_v26 }
 0x131   : > { %v563_v24 = vpop.f32.mrb[8].mxu0  ;;  %v613_v39 = vadd.f32 %v612_v29, %v2166_v30  ;;  %v641_v56 = vmax.f32 %v2148_v15, %v2166_v30 }
 0x132   : > { %v564_v27 = vadd.f32 %v563_v24, %v302_v2  ;;  %v565_v28 = vpop.f32.mrb[9].mxu0 }
 0x133   : > { %v566_v31 = vadd.f32 %v565_v28, %v306_v3  ;;  %v567_v32 = vpop.f32.mrb[10].mxu0 }
 0x134   : > { %v2168_v33 = vmax.f32 %v564_v27, 0.0  ;;  %v568_v34 = vadd.f32 %v567_v32, %v302_v2  ;;  %v569_v35 = vpop.f32.mrb[11].mxu0 }
 0x135   : > { %v2170_v36 = vmax.f32 %v566_v31, 0.0  ;;  %v570_v37 = vadd.f32 %v569_v35, %v306_v3 }
 0x136   : > { %v601_v40 = vadd.f32 %v600_v38, %v2168_v33  ;;  %v2175_v41 = vmax.f32 %v568_v34, 0.0  ;;  %v629_v61 = vmax.f32 %v627_v47, %v2168_v33 }
 0x137   : > { %v614_v42 = vadd.f32 %v613_v39, %v2170_v36  ;;  %v2178_v43 = vmax.f32 %v570_v37, 0.0  ;;  %v642_v1 = vmax.f32 %v640_v48, %v2170_v36 }
 0x138   : > { %v602_v52 = vadd.f32 %v601_v40, %v2175_v41  ;;  %v630_v62 = vmax.f32 %v628_v51, %v2175_v41 }
 0x139   : > { %v573_v44 = vpop.f32.mrb[12].mxu0  ;;  %v615_v57 = vadd.f32 %v614_v42, %v2178_v43 }
 0x13a   : > { %v574_v45 = vadd.f32 %v573_v44, %v302_v2  ;;  %v575_v46 = vpop.f32.mrb[13].mxu0 }
 0x13b   : > { %v576_v49 = vadd.f32 %v575_v46, %v306_v3  ;;  %v577_v50 = vpop.f32.mrb[14].mxu0 }
 0x13c   : > { %v2187_v53 = vmax.f32 %v574_v45, 0.0  ;;  %v578_v54 = vadd.f32 %v577_v50, %v302_v2  ;;  %v579_v55 = vpop.f32.mrb[15].mxu0  ;;  %v643_v2 = vmax.f32 %v641_v56, %v2178_v43 }
 0x13d   : > { %v2192_v58 = vmax.f32 %v576_v49, 0.0  ;;  %v580_v59 = vadd.f32 %v579_v55, %v306_v3  ;;  %v1764_v55 = vld [vmem:[%s2426_s4] ss:$8 sps:$4 sm:$0xff]  }
 0x13e   : > { %v603_v63 = vadd.f32 %v602_v52, %v2187_v53  ;;  %v2197_v0 = vmax.f32 %v578_v54, 0.0  ;;  %v631_v6 = vmax.f32 %v629_v61, %v2187_v53  ;;  %v1772_v61 = vld [vmem:[%s2426_s4 + $0x24] ss:$8 sps:$4 sm:$0xff]  }
 0x13f   : > { %v616_v4 = vadd.f32 %v615_v57, %v2192_v58  ;;  %v2202_v5 = vmax.f32 %v580_v59, 0.0  ;;  %v644_v8 = vmax.f32 %v642_v1, %v2192_v58  ;;  %v1769_v57 = vld [vmem:[%s2426_s4 + $0x14] ss:$8 sps:$4 sm:$0xff]   ;;  %v1767_v59 = vld [vmem:[%s2426_s4 + $0x10] ss:$8 sps:$4 sm:$0xff]  }
 0x140   : > { %v604_v3 = vadd.f32 %v603_v63, %v2197_v0  ;;  %v632_v7 = vmax.f32 %v630_v62, %v2197_v0  ;;  %v1770_v62 = vld [vmem:[%s2426_s4 + $0x20] ss:$8 sps:$4 sm:$0xff]   ;;  %v1775_v63 = vld [vmem:[%s2426_s4 + $0x34] ss:$8 sps:$4 sm:$0xff]   ;;  %v1773_v1 = vld [vmem:[%s2426_s4 + $0x30] ss:$8 sps:$4 sm:$0xff]  }
 0x141   : > { %v617_v9 = vadd.f32 %v616_v4, %v2202_v5  ;;  %v645_v10 = vmax.f32 %v643_v2, %v2202_v5  ;;  %v1778_v2 = vld [vmem:[%s2426_s4 + $0x44] ss:$8 sps:$4 sm:$0xff]   ;;  %v1776_v4 = vld [vmem:[%s2426_s4 + $0x40] ss:$8 sps:$4 sm:$0xff]  }
 0x142   : > { %v605_v11 = vrot.slane %v604_v3, 4  ;;  %v633_v12 = vmax.f32 %v631_v6, %v632_v7  ;;  %v1781_v6 = vld [vmem:[%s2426_s4 + $0x54] ss:$8 sps:$4 sm:$0xff]   ;;  %v1784_v7 = vld [vmem:[%s2426_s4 + $0x64] ss:$8 sps:$4 sm:$0xff]  }
 0x143   : > { %v618_v14 = vrot.slane %v617_v9, 4  ;;  %v646_v18 = vmax.f32 %v644_v8, %v645_v10  ;;  %v1782_v8 = vld [vmem:[%s2426_s4 + $0x60] ss:$8 sps:$4 sm:$0xff]   ;;  %v1785_v10 = vld [vmem:[%s2426_s4 + $0x70] ss:$8 sps:$4 sm:$0xff]  }
 0x144   : > { %v606_v21 = vadd.f32 %v605_v11, %v604_v3  ;;  %v634_v22 = vrot.slane %v633_v12, 4  ;;  %v1779_v3 = vld [vmem:[%s2426_s4 + $0x50] ss:$8 sps:$4 sm:$0xff]   ;;  %v1892_v11 = vmov 0  }
 0x145   : > { %v619_v23 = vadd.f32 %v618_v14, %v617_v9  ;;  %v647_v24 = vrot.slane %v646_v18, 4  ;;  %v1787_v9 = vld [vmem:[%s2426_s4 + $0x74] ss:$8 sps:$4 sm:$0xff]   ;;  %1687 = vset.pattern.permute.xlu1 %v1892_v11  ;;  %1686 = vset.pattern.permute.xlu0 %v1892_v11 }
 0x146   : > { %v607_v25 = vrot.slane %v606_v21, 2  ;;  %v635_v27 = vmax.f32 %v633_v12, %v634_v22 }
 0x147   : > { %v620_v28 = vrot.slane %v619_v23, 2  ;;  %v648_v29 = vmax.f32 %v646_v18, %v647_v24 }
 0x148   : > { %v608_v31 = vadd.f32 %v607_v25, %v606_v21  ;;  %v636_v32 = vrot.slane %v635_v27, 2 }
 0x149   : > { %v621_v34 = vadd.f32 %v620_v28, %v619_v23  ;;  %v649_v35 = vrot.slane %v648_v29, 2 }
 0x14a   : > { %v609_v37 = vrot.slane %v608_v31, 1  ;;  %v637_v38 = vmax.f32 %v635_v27, %v636_v32 }
 0x14b   : > { %v622_v39 = vrot.slane %v621_v34, 1  ;;  %v650_v40 = vmax.f32 %v648_v29, %v649_v35 }
 0x14c   : > { %v610_v42 = vadd.f32 %v609_v37, %v608_v31  ;;  %v638_v44 = vrot.slane %v637_v38, 1 }
 0x14d   : > { %v623_v45 = vadd.f32 %v622_v39, %v621_v34  ;;  %v651_v46 = vrot.slane %v650_v40, 1 }
 0x14e   : > { %v625_v47 = vmul.f32 0.015625, %v610_v42  ;;  %v639_v48 = vmax.f32 %v637_v38, %v638_v44 }
 0x14f   : > { %v626_v49 = vmul.f32 0.015625, %v623_v45  ;;  %v652_v50 = vmax.f32 %v650_v40, %v651_v46 }
 0x150   : > { %v654_v51 = vsel %vm653_vm0, %v625_v47, %v639_v48 }
 0x151   : > { %v655_v52 = vsel %vm653_vm0, %v626_v49, %v652_v50  ;;  %v656_v56 = vpack.c.bf16 %v654_v51, %v654_v51 }
 0x152   : > { %v657_v54 = vpack.c.bf16 %v655_v52, %v655_v52 }
 0x154   : > { %818 = vmatprep.mubr.bf16.mxu1 %v657_v54 }
 0x155   : > { %819 = vmatmul.mubr.bf16.vlgmr.msra.gmra.mrb[0].mxu1 %v656_v56 }
 0x156   : > { %925 = vmatpush1.bf16.msra.mxu1 %v1764_v55  ;;  %956 = vmatprep.mubr.bf16.mxu1 %v1892_v11 }
 0x157   : > { %926 = vmatprep.subr.bf16.mxu1 %v1769_v57 }
 0x15a   : > { %927 = vmatpush1.bf16.msra.mxu1 %v1767_v59 }
 0x15b   : > { %928 = vmatprep.subr.bf16.mxu1 %v1772_v61 }
 0x15e   : > { %929 = vmatpush1.bf16.msra.mxu1 %v1770_v62 }
 0x15f   : > { %930 = vmatprep.subr.bf16.mxu1 %v1775_v63 }
 0x162   : > { %931 = vmatpush1.bf16.msra.mxu1 %v1773_v1 }
 0x163   : > { %932 = vmatprep.subr.bf16.mxu1 %v1778_v2 }
 0x166   : > { %933 = vmatpush1.bf16.msra.mxu1 %v1776_v4 }
 0x167   : > { %934 = vmatprep.subr.bf16.mxu1 %v1781_v6 }
 0x16a   : > { %935 = vmatpush1.bf16.msra.mxu1 %v1779_v3 }
 0x16b   : > { %936 = vmatprep.subr.bf16.mxu1 %v1784_v7 }
 0x16e   : > { %937 = vmatpush1.bf16.msra.mxu1 %v1782_v8 }
 0x16f   : > { %938 = vmatprep.subr.bf16.mxu1 %v1787_v9 }
 0x172   : > { %939 = vmatpush1.bf16.msra.mxu1 %v1785_v10 }
 0x228   : > { %v1522_v12 = vpop.f32.mrb[0].mxu1 }
 0x229   : > { %v1523_v14 = vpop.f32.mrb[1].mxu1 }
 0x22a   : > { %v1524_v18 = vadd.f32 %v1523_v14, %v1522_v12  ;;  %v1525_v21 = vpop.f32.mrb[2].mxu1 }
 0x22b   : > { %v1526_v22 = vpop.f32.mrb[3].mxu1 }
 0x22c   : > { %v826_v23 = vmax.f32 %v1524_v18, 0.0 }
 0x22e   : > { %v827_v24 = vpack.c.bf16 %v826_v23, %v826_v23 }
 0x230   : > { %957 = vmatmul.mubr.bf16.vlgmr.msra.gmra.mrb[4].mxu1 %v827_v24 }
 0x303   : > { %v958_v25 = vpop.f32.mrb[4].mxu1 }
 0x304   : > { %v967_v27 = vrot.slane %v958_v25, 1  ;;  %v960_v28 = vpop.f32.mrb[5].mxu1 }
 0x305   : > { %v968_v29 = vrot.slane %v960_v28, 1  ;;  %v962_v31 = vpop.f32.mrb[6].mxu1 }
 0x306   : > { %v971_v32 = vadd.f32 %v967_v27, %v958_v25  ;;  %v963_v34 = vpop.f32.mrb[7].mxu1 }
 0x307   : > { %v972_v35 = vadd.f32 %v968_v29, %v960_v28  ;;  %v1065_v28 = vld [vmem:[%s2427_s5] sm:$0xff] }
 0x308   : > { %v1487_v37 = vmul.f32 -1.442695, %v971_v32  ;;  %1584 = vmatprep.mubr.f32.mxu0 %v1065_v28  ;;  %v1069_v29 = vld [vmem:[%s2427_s5 + $0x20] sm:$0xff] }
 0x309   : > { %v1488_v38 = vmul.f32 -1.442695, %v972_v35  ;;  %1590 = vmatprep.mubr.f32.mxu1 %v1069_v29 }
 0x30a   : > { %1788 = vpow2.f32 %v1487_v37 }
 0x30b   : > { %1790 = vpow2.f32 %v1488_v38 }
 0x314   : > { %v1789_v39 = vpop.eup %1788 }
 0x315   : > { %v1791_v40 = vpop.eup %1790  ;;  %v979_v42 = vadd.f32 1.0, %v1789_v39 }
 0x316   : > { %v980_v44 = vadd.f32 1.0, %v1791_v40 }
 0x317   : > { %1792 = vrcp.f32 %v979_v42 }
 0x318   : > { %1794 = vrcp.f32 %v980_v44 }
 0x321   : > { %v1793_v45 = vpop.eup %1792 }
 0x322   : > { %v1795_v46 = vpop.eup %1794  ;;  %v2256_v47 = vrot.slane %v1793_v45, %v2140_v60 }
 0x323   : > { %v2259_v48 = vrot.slane %v1795_v46, %v2140_v60 }
 0x324   : > { %v997_v49 = vmul.f32 %v2256_v47, %v2152_v17  ;;  %v993_v50 = vmul.f32 %v2256_v47, %v2150_v16  ;;  %v999_v54 = vmul.f32 %v2256_v47, %v2163_v26  ;;  %v995_v55 = vmul.f32 %v2256_v47, %v2146_v13 }
 0x325   : > { %v998_v51 = vmul.f32 %v2259_v48, %v2156_v20  ;;  %v994_v52 = vmul.f32 %v2259_v48, %v2154_v19  ;;  %v1000_v57 = vmul.f32 %v2259_v48, %v2166_v30  ;;  %v996_v59 = vmul.f32 %v2259_v48, %v2148_v15 }
 0x326   : > { %v1003_v61 = vmul.f32 %v2256_v47, %v2175_v41  ;;  %v1004_v62 = vmul.f32 %v2259_v48, %v2178_v43  ;;  %v1001_v63 = vmul.f32 %v2256_v47, %v2168_v33  ;;  %v1002_v1 = vmul.f32 %v2259_v48, %v2170_v36 }
 0x327   : > { %v1015_v60 = vadd.f32 %v998_v51, %v997_v49  ;;  %v1009_v56 = vadd.f32 %v994_v52, %v993_v50  ;;  %v1018_v2 = vadd.f32 %v1000_v57, %v999_v54  ;;  %v1012_v4 = vadd.f32 %v996_v59, %v995_v55 }
 0x328   : > { %v1024_v6 = vadd.f32 %v1004_v62, %v1003_v61  ;;  %v1021_v3 = vadd.f32 %v1002_v1, %v1001_v63  ;;  %v1007_v7 = vmul.f32 %v2256_v47, %v2197_v0  ;;  %v1008_v8 = vmul.f32 %v2259_v48, %v2202_v5 }
 0x329   : > { %1016 = vadd.xlane.f32.xlu1 %v1015_v60  ;;  %1010 = vadd.xlane.f32.xlu0 %v1009_v56  ;;  %v1005_v9 = vmul.f32 %v2256_v47, %v2187_v53  ;;  %v1006_v10 = vmul.f32 %v2259_v48, %v2192_v58  ;;  %v1044_v14 = vmax.f32 %v995_v55, %v996_v59 }
 0x32a   : > { %v1030_v11 = vadd.f32 %v1008_v8, %v1007_v7  ;;  %v1041_v18 = vmax.f32 %v993_v50, %v994_v52  ;;  %v1050_v21 = vmax.f32 %v999_v54, %v1000_v57  ;;  %v1047_v22 = vmax.f32 %v997_v49, %v998_v51 }
 0x32b   : > { %v1027_v12 = vadd.f32 %v1006_v10, %v1005_v9  ;;  %v1056_v23 = vmax.f32 %v1003_v61, %v1004_v62  ;;  %v1053_v24 = vmax.f32 %v1001_v63, %v1002_v1  ;;  %v1062_v25 = vmax.f32 %v1007_v7, %v1008_v8 }
 0x32c   : > { %v1059_v27 = vmax.f32 %v1005_v9, %v1006_v10  ;;  %v1066_v9 = vld [vmem:[%s2427_s5 + $0x8] sm:$0xff] }
 0x32d   : > { %1019 = vadd.xlane.f32.xlu1 %v1018_v2  ;;  %1013 = vadd.xlane.f32.xlu0 %v1012_v4  ;;  %v1070_v10 = vld [vmem:[%s2427_s5 + $0x28] sm:$0xff] }
 0x331   : > { %1025 = vadd.xlane.f32.xlu1 %v1024_v6  ;;  %1022 = vadd.xlane.f32.xlu0 %v1021_v3 }
 0x335   : > { %1031 = vadd.xlane.f32.xlu1 %v1030_v11  ;;  %1028 = vadd.xlane.f32.xlu0 %v1027_v12  ;;  %v1067_v11 = vld [vmem:[%s2427_s5 + $0x10] sm:$0xff] }
 0x336   : > { %v1071_v12 = vld [vmem:[%s2427_s5 + $0x30] sm:$0xff] }
 0x339   : > { %1045 = vmax.xlane.f32.xlu1 %v1044_v14  ;;  %1042 = vmax.xlane.f32.xlu0 %v1041_v18  ;;  %v1068_v14 = vld [vmem:[%s2427_s5 + $0x18] sm:$0xff] }
 0x33a   : > { %v1072_v18 = vld [vmem:[%s2427_s5 + $0x38] sm:$0xff] }
 0x33d   : > { %1051 = vmax.xlane.f32.xlu1 %v1050_v21  ;;  %1048 = vmax.xlane.f32.xlu0 %v1047_v22 }
 0x341   : > { %1057 = vmax.xlane.f32.xlu1 %v1056_v23  ;;  %1054 = vmax.xlane.f32.xlu0 %v1053_v24 }
 0x345   : > { %1063 = vmax.xlane.f32.xlu1 %v1062_v25  ;;  %1060 = vmax.xlane.f32.xlu0 %v1059_v27 }
 0x3b6   : > { %v1017_v31 = vpop.xlane.xlu1 %1016  ;;  %v1011_v32 = vpop.xlane.xlu0 %1010 }
 0x3b7   : > { %v1033_v37 = vmul.f32 0.005952381, %v1011_v32  ;;  %v1035_v40 = vmul.f32 0.005952381, %v1017_v31 }
 0x3ba   : > { %v1020_v34 = vpop.xlane.xlu1 %1019  ;;  %v1014_v35 = vpop.xlane.xlu0 %1013 }
 0x3bb   : > { %v1036_v38 = vmul.f32 0.005952381, %v1020_v34  ;;  %v1034_v39 = vmul.f32 0.005952381, %v1014_v35 }
 0x3bd   : > { %v1596_v42 = vpack.c.bf16 %v1034_v39, %v1033_v37  ;;  %v1600_v46 = vpack.c.bf16 %v1036_v38, %v1035_v40 }
 0x3be   : > { %v1026_v44 = vpop.xlane.xlu1 %1025  ;;  %v1023_v45 = vpop.xlane.xlu0 %1022 }
 0x3bf   : > { %v1038_v49 = vmul.f32 0.005952381, %v1026_v44  ;;  %v1037_v50 = vmul.f32 0.005952381, %v1023_v45  ;;  %1597 = vmatprep.subr.bf16.mxu0 %v1596_v42  ;;  %1628 = vmatprep.subr.bf16.mxu1 %v1596_v42 }
 0x3c0   : > { %1599 = vmatpush3.bf16.msra.mxu0 %v1596_v42  ;;  %1636 = vmatpush3.bf16.msra.mxu1 %v1596_v42 }
 0x3c1   : > { %1601 = vmatprep.subr.bf16.mxu0 %v1600_v46  ;;  %1629 = vmatprep.subr.bf16.mxu1 %v1600_v46  ;;  %v1604_v54 = vpack.c.bf16 %v1038_v49, %v1037_v50 }
 0x3c2   : > { %v1032_v51 = vpop.xlane.xlu1 %1031  ;;  %v1029_v52 = vpop.xlane.xlu0 %1028 }
 0x3c3   : > { %v1040_v55 = vmul.f32 0.005952381, %v1032_v51  ;;  %v1039_v60 = vmul.f32 0.005952381, %v1029_v52 }
 0x3c4   : > { %1603 = vmatpush3.bf16.msra.mxu0 %v1600_v46  ;;  %1637 = vmatpush3.bf16.msra.mxu1 %v1600_v46 }
 0x3c5   : > { %1605 = vmatprep.subr.bf16.mxu0 %v1604_v54  ;;  %1630 = vmatprep.subr.bf16.mxu1 %v1604_v54  ;;  %v1608_v59 = vpack.c.bf16 %v1040_v55, %v1039_v60 }
 0x3c6   : > { %v1046_v56 = vpop.xlane.xlu1 %1045  ;;  %v1043_v57 = vpop.xlane.xlu0 %1042 }
 0x3c7   : > { %v1612_v63 = vpack.c.bf16 %v1046_v56, %v1043_v57 }
 0x3c8   : > { %1607 = vmatpush3.bf16.msra.mxu0 %v1604_v54  ;;  %1638 = vmatpush3.bf16.msra.mxu1 %v1604_v54 }
 0x3c9   : > { %1609 = vmatprep.subr.bf16.mxu0 %v1608_v59  ;;  %1631 = vmatprep.subr.bf16.mxu1 %v1608_v59 }
 0x3ca   : > { %v1052_v61 = vpop.xlane.xlu1 %1051  ;;  %v1049_v62 = vpop.xlane.xlu0 %1048 }
 0x3cb   : > { %v1616_v4 = vpack.c.bf16 %v1052_v61, %v1049_v62 }
 0x3cc   : > { %1611 = vmatpush3.bf16.msra.mxu0 %v1608_v59  ;;  %1639 = vmatpush3.bf16.msra.mxu1 %v1608_v59 }
 0x3cd   : > { %1613 = vmatprep.subr.bf16.mxu0 %v1612_v63  ;;  %1632 = vmatprep.subr.bf16.mxu1 %v1612_v63 }
 0x3ce   : > { %v1058_v1 = vpop.xlane.xlu1 %1057  ;;  %v1055_v2 = vpop.xlane.xlu0 %1054 }
 0x3cf   : > { %v1620_v6 = vpack.c.bf16 %v1058_v1, %v1055_v2 }
 0x3d0   : > { %1615 = vmatpush3.bf16.msra.mxu0 %v1612_v63  ;;  %1640 = vmatpush3.bf16.msra.mxu1 %v1612_v63 }
 0x3d1   : > { %1617 = vmatprep.subr.bf16.mxu0 %v1616_v4  ;;  %1633 = vmatprep.subr.bf16.mxu1 %v1616_v4 }
 0x3d2   : > { %v1064_v3 = vpop.xlane.xlu1 %1063  ;;  %v1061_v7 = vpop.xlane.xlu0 %1060 }
 0x3d3   : > { %v1624_v8 = vpack.c.bf16 %v1064_v3, %v1061_v7 }
 0x3d4   : > { %1619 = vmatpush3.bf16.msra.mxu0 %v1616_v4  ;;  %1641 = vmatpush3.bf16.msra.mxu1 %v1616_v4 }
 0x3d5   : > { %1621 = vmatprep.subr.bf16.mxu0 %v1620_v6  ;;  %1634 = vmatprep.subr.bf16.mxu1 %v1620_v6 }
 0x3d8   : > { %1623 = vmatpush3.bf16.msra.mxu0 %v1620_v6  ;;  %1642 = vmatpush3.bf16.msra.mxu1 %v1620_v6 }
 0x3d9   : > { %1625 = vmatprep.subr.bf16.mxu0 %v1624_v8  ;;  %1635 = vmatprep.subr.bf16.mxu1 %v1624_v8 }
 0x3dc   : > { %1627 = vmatpush3.bf16.msra.mxu0 %v1624_v8  ;;  %1643 = vmatpush3.bf16.msra.mxu1 %v1624_v8 }
 0x3df   : > { %1585 = vmatmul.mubr.f32.vlgmr.msra.gmra.mrb[16].mxu0 %v1066_v9  ;;  %1591 = vmatmul.mubr.f32.vlgmr.msra.gmra.mrb[8].mxu1 %v1070_v10 }
 0x3e0   : > { %1587 = vmatprep.mubr.f32.mxu0 %v1067_v11  ;;  %1593 = vmatprep.mubr.f32.mxu1 %v1071_v12 }
 0x3e3   : > { %1588 = vmatmul.mubr.f32.gmra.mrb[18].mxu0 %v1068_v14  ;;  %1594 = vmatmul.mubr.f32.gmra.mrb[10].mxu1 %v1072_v18 }
 0x4b2   : > { %v1586_v21 = vpop.f32.mrb[16].mxu0  ;;  %v1592_v22 = vpop.f32.mrb[8].mxu1 }
 0x4b3   : > { %v1490_v23 = vmul.f32 -1.442695, %v1586_v21  ;;  %v1139_v24 = vpop.f32.mrb[17].mxu0  ;;  %v1494_v25 = vmul.f32 -1.442695, %v1592_v22  ;;  %v1159_v27 = vpop.f32.mrb[9].mxu1 }
 0x4b4   : > { %v1489_v28 = vmul.f32 -1.442695, %v1139_v24  ;;  %v1493_v29 = vmul.f32 -1.442695, %v1159_v27 }
 0x4b5   : > { %1796 = vpow2.f32 %v1490_v23 }
 0x4b6   : > { %1798 = vpow2.f32 %v1489_v28  ;;  %v1589_v31 = vpop.f32.mrb[18].mxu0  ;;  %v1595_v32 = vpop.f32.mrb[10].mxu1 }
 0x4b7   : > { %1800 = vpow2.f32 %v1494_v25  ;;  %v1492_v34 = vmul.f32 -1.442695, %v1589_v31  ;;  %v1149_v35 = vpop.f32.mrb[19].mxu0  ;;  %v1169_v37 = vpop.f32.mrb[11].mxu1  ;;  %v1496_v52 = vmul.f32 -1.442695, %v1595_v32 }
 0x4b8   : > { %1802 = vpow2.f32 %v1493_v29  ;;  %v1491_v38 = vmul.f32 -1.442695, %v1149_v35  ;;  %v1495_v39 = vmul.f32 -1.442695, %v1169_v37 }
 0x4b9   : > { %1804 = vpow2.f32 %v1492_v34 }
 0x4ba   : > { %1806 = vpow2.f32 %v1491_v38 }
 0x4bb   : > { %1808 = vpow2.f32 %v1495_v39 }
 0x4bf   : > { %v1797_v40 = vpop.eup %1796 }
 0x4c0   : > { %v1799_v42 = vpop.eup %1798  ;;  %v1203_v44 = vadd.f32 1.0, %v1797_v40 }
 0x4c1   : > { %v1801_v45 = vpop.eup %1800  ;;  %v1202_v46 = vadd.f32 1.0, %v1799_v42 }
 0x4c2   : > { %1810 = vrcp.f32 %v1203_v44  ;;  %v1207_v49 = vadd.f32 1.0, %v1801_v45  ;;  %v1803_v50 = vpop.eup %1802 }
 0x4c3   : > { %1812 = vrcp.f32 %v1202_v46  ;;  %v1805_v51 = vpop.eup %1804  ;;  %v1206_v54 = vadd.f32 1.0, %v1803_v50 }
 0x4c4   : > { %1814 = vrcp.f32 %v1207_v49  ;;  %v1205_v55 = vadd.f32 1.0, %v1805_v51  ;;  %v1807_v60 = vpop.eup %1806 }
 0x4c5   : > { %1816 = vpow2.f32 %v1496_v52  ;;  %v1809_v56 = vpop.eup %1808  ;;  %v1204_v62 = vadd.f32 1.0, %v1807_v60 }
 0x4c6   : > { %1818 = vrcp.f32 %v1206_v54  ;;  %v1208_v63 = vadd.f32 1.0, %v1809_v56 }
 0x4c7   : > { %1820 = vrcp.f32 %v1205_v55 }
 0x4c8   : > { %1822 = vrcp.f32 %v1204_v62 }
 0x4c9   : > { %1824 = vrcp.f32 %v1208_v63 }
 0x4cc   : > { %v1811_v57 = vpop.eup %1810 }
 0x4cd   : > { %v1813_v59 = vpop.eup %1812  ;;  %1233 = vperm.xlu1 %1687, %v1811_v57  }
 0x4ce   : > { %v1815_v61 = vpop.eup %1814  ;;  %1228 = vperm.xlu0 %1686, %v1813_v59  }
 0x4cf   : > { %v1817_v1 = vpop.eup %1816 }
 0x4d0   : > { %v1819_v2 = vpop.eup %1818  ;;  %v1209_v6 = vadd.f32 1.0, %v1817_v1 }
 0x4d1   : > { %1253 = vperm.xlu1 %1687, %v1815_v61   ;;  %v1821_v4 = vpop.eup %1820 }
 0x4d2   : > { %1826 = vrcp.f32 %v1209_v6  ;;  %v1823_v3 = vpop.eup %1822 }
 0x4d3   : > { %v1825_v7 = vpop.eup %1824 }
 0x4d5   : > { %1248 = vperm.xlu1 %1687, %v1819_v2  }
 0x4d9   : > { %1243 = vperm.xlu1 %1687, %v1821_v4  }
 0x4dc   : > { %v1827_v8 = vpop.eup %1826 }
 0x4dd   : > { %1238 = vperm.xlu1 %1687, %v1823_v3  }
 0x4e1   : > { %1258 = vperm.xlu1 %1687, %v1825_v7  }
 0x4e5   : > { %1263 = vperm.xlu1 %1687, %v1827_v8  }
 0x54c   : > { %v1234_v9 = vpop.permute.xlu1 %1233 }
 0x54d   : > { %v1268_v10 = vmul.f32 %v1234_v9, %v2256_v47  ;;  %v1269_v11 = vmul.f32 %v1234_v9, %v2259_v48  ;;  %v1229_v12 = vpop.permute.xlu0 %1228 }
 0x54e   : > { %v1266_v14 = vmul.f32 %v1229_v12, %v2256_v47  ;;  %v1267_v18 = vmul.f32 %v1229_v12, %v2259_v48 }
 0x54f   : > { %v1284_v21 = vadd.f32 1.0, %v1268_v10  ;;  %v1285_v22 = vadd.f32 1.0, %v1269_v11 }
 0x550   : > { %v1282_v23 = vadd.f32 1.0, %v1266_v14  ;;  %v1283_v24 = vadd.f32 1.0, %v1267_v18  ;;  %v1254_v25 = vpop.permute.xlu1 %1253 }
 0x551   : > { %v1300_v27 = vmul.f32 %v1284_v21, %v2146_v13  ;;  %v1301_v28 = vmul.f32 %v1285_v22, %v2148_v15  ;;  %v1276_v29 = vmul.f32 %v1254_v25, %v2256_v47  ;;  %v1277_v31 = vmul.f32 %v1254_v25, %v2259_v48 }
 0x552   : > { %v1298_v32 = vmul.f32 %v1282_v23, %v2150_v16  ;;  %v1299_v34 = vmul.f32 %v1283_v24, %v2154_v19 }
 0x553   : > { %1316 = vst [vmem:[%s2330_s14 + $0x10] sm:$0xff] %v1300_v27  ;;  %1317 = vst [vmem:[%s2330_s14 + $0x18] sm:$0xff] %v1301_v28  ;;  %v1292_v13 = vadd.f32 1.0, %v1276_v29  ;;  %v1293_v15 = vadd.f32 1.0, %v1277_v31 }
 0x554   : > { %1314 = vst [vmem:[%s2330_s14] sm:$0xff] %v1298_v32  ;;  %1315 = vst [vmem:[%s2330_s14 + $0x8] sm:$0xff] %v1299_v34  ;;  %v1249_v35 = vpop.permute.xlu1 %1248 }
 0x555   : > { %v1308_v16 = vmul.f32 %v1292_v13, %v2175_v41  ;;  %v1309_v19 = vmul.f32 %v1293_v15, %v2178_v43  ;;  %v1274_v37 = vmul.f32 %v1249_v35, %v2256_v47  ;;  %v1275_v38 = vmul.f32 %v1249_v35, %v2259_v48 }
 0x557   : > { %1324 = vst [vmem:[%s2330_s14 + $0x50] sm:$0xff] %v1308_v16  ;;  %1325 = vst [vmem:[%s2330_s14 + $0x58] sm:$0xff] %v1309_v19  ;;  %v1290_v39 = vadd.f32 1.0, %v1274_v37  ;;  %v1291_v40 = vadd.f32 1.0, %v1275_v38 }
 0x558   : > { %v1244_v42 = vpop.permute.xlu1 %1243 }
 0x559   : > { %v1306_v44 = vmul.f32 %v1290_v39, %v2168_v33  ;;  %v1307_v45 = vmul.f32 %v1291_v40, %v2170_v36  ;;  %v1272_v46 = vmul.f32 %v1244_v42, %v2256_v47  ;;  %v1273_v41 = vmul.f32 %v1244_v42, %v2259_v48 }
 0x55b   : > { %1322 = vst [vmem:[%s2330_s14 + $0x40] sm:$0xff] %v1306_v44  ;;  %1323 = vst [vmem:[%s2330_s14 + $0x48] sm:$0xff] %v1307_v45  ;;  %v1288_v43 = vadd.f32 1.0, %v1272_v46  ;;  %v1289_v49 = vadd.f32 1.0, %v1273_v41 }
 0x55c   : > { %v1239_v50 = vpop.permute.xlu1 %1238 }
 0x55d   : > { %v1304_v51 = vmul.f32 %v1288_v43, %v2163_v26  ;;  %v1305_v52 = vmul.f32 %v1289_v49, %v2166_v30  ;;  %v1270_v54 = vmul.f32 %v1239_v50, %v2256_v47  ;;  %v1271_v33 = vmul.f32 %v1239_v50, %v2259_v48 }
 0x55f   : > { %1320 = vst [vmem:[%s2330_s14 + $0x30] sm:$0xff] %v1304_v51  ;;  %1321 = vst [vmem:[%s2330_s14 + $0x38] sm:$0xff] %v1305_v52  ;;  %v1286_v36 = vadd.f32 1.0, %v1270_v54  ;;  %v1287_v55 = vadd.f32 1.0, %v1271_v33 }
 0x560   : > { %v1259_v60 = vpop.permute.xlu1 %1258 }
 0x561   : > { %v1302_v56 = vmul.f32 %v1286_v36, %v2152_v17  ;;  %v1303_v57 = vmul.f32 %v1287_v55, %v2156_v20  ;;  %v1278_v26 = vmul.f32 %v1259_v60, %v2256_v47  ;;  %v1279_v30 = vmul.f32 %v1259_v60, %v2259_v48 }
 0x563   : > { %1318 = vst [vmem:[%s2330_s14 + $0x20] sm:$0xff] %v1302_v56  ;;  %1319 = vst [vmem:[%s2330_s14 + $0x28] sm:$0xff] %v1303_v57  ;;  %v1294_v59 = vadd.f32 1.0, %v1278_v26  ;;  %v1295_v61 = vadd.f32 1.0, %v1279_v30 }
 0x564   : > { %v1264_v62 = vpop.permute.xlu1 %1263 }
 0x565   : > { %v1310_v63 = vmul.f32 %v1294_v59, %v2187_v53  ;;  %v1311_v1 = vmul.f32 %v1295_v61, %v2192_v58  ;;  %v1280_v17 = vmul.f32 %v1264_v62, %v2256_v47  ;;  %v1281_v20 = vmul.f32 %v1264_v62, %v2259_v48 }
 0x567   : > { %1326 = vst [vmem:[%s2330_s14 + $0x60] sm:$0xff] %v1310_v63  ;;  %1327 = vst [vmem:[%s2330_s14 + $0x68] sm:$0xff] %v1311_v1  ;;  %v1296_v2 = vadd.f32 1.0, %v1280_v17  ;;  %v1297_v4 = vadd.f32 1.0, %v1281_v20 }
 0x569   : > { %v1312_v53 = vmul.f32 %v1296_v2, %v2197_v0  ;;  %v1313_v58 = vmul.f32 %v1297_v4, %v2202_v5 }
 0x56b   : > { %1328 = vst [vmem:[%s2330_s14 + $0x70] sm:$0xff] %v1312_v53  ;;  %1329 = vst [vmem:[%s2330_s14 + $0x78] sm:$0xff] %v1313_v58 }
 0x56c   : > { %1841 = shalt.err (!%p1838_p3)
}
 0x56d   : > { %s1842_s11 = scalar_lea.hbm %s2371_s20, 2048  ;;  %s1846_s13 = scalar_lea.hbm %s2428_s6, 4096 }
 0x56e   : > { %p1843_p4 = scmp.ne.s32.totalorder %s2371_s20, %s1842_s11  ;;  %p1847_p9 = scmp.lt.u32.totalorder %s2371_s20, %s2428_s6 }
 0x56f   : > { %p1848_p10 = scmp.lt.u32.totalorder %s1846_s13, %s1842_s11  ;;  %p1850_p12 = scmp.lt.u32.totalorder %s1842_s11, %s2371_s20 }
 0x570   : > { %p1844_p7 = pnand %p1843_p4, %p1969_p5 }
 0x571   : > { %p1849_p11 = por %p1848_p10, %p1847_p9 }
 0x572   : > { %p1845_p8 = pneg %p1844_p7 }
 0x573   : > { %p1851_p13 = por %p1850_p12, %p1849_p11 }
 0x575   : > { %p1852_p0 = pnand %p1851_p13, %p1845_p8 }
 0x577   : > { %1855 = shalt.err (!%p1852_p0)
}
 0x578   : > { %s1894_s15 = smov 256   ;;  %s1895_s17 = smov 16  }
 0x579   : > { %1644 = dma.vmem_to_hbm [thread:$0]  (%p1969_p5), %s2373_s16, 2048, %s2371_s20, %s2381_s25, %s1894_s15, %s1894_s15, %s1895_s17  }
 0x57a PF: > { %p1650_p1 = scmp.ge.s32.totalorder %s1890_s24, 2  ;;  %s1360_s18 = sand.u32 1, %s1878_s21  }
 0x57b   : > { %s1361_s26 = scalar_lea.sflag [#allocation3], %s1360_s18 }
 0x57c   : > { %p1647_p2 = pnand %p1650_p1, %p1973_p6 }
 0x57e   : > { %1873 = dma.done.wait (!%p1647_p2), %s1361_s26, 2048  }
 0x57f   : > { %1875 = vsyncadd (!%p1647_p2), %s1361_s26, 4294965248  ;;  %p16_p3 = scmp.ge.s32.totalorder %s1956_s27, 4   ;;  %s2431_s21 = smov %s1882_s22 }
 0x580   : > { %s2432_s22 = smov %s1886_s23  ;;  %s2433_s23 = smov %s1967_s30 }
 0x581   : > { %s2434_s24 = smov %s1956_s27  ;;  %18 = sbr.rel (!%p16_p3) target bundleno = 3 (0x3), region = 79 }
 0x588   :  { %1366 = vsyncpa [#allocation3], 1 }
 0x589   :  { %1368 = vsyncpa [#allocation3 + $0x1], 1 }

</bundles_post_ra>
